<compile_context>
chip_gen: v7x
topology: tpu7x:2x2x1
jax: 0.10.0
libtpu: 0.0.40
codegen_flags: <defaults>
</compile_context>

<pallas_src>
import functools

import jax
import jax.numpy as jnp
from jax.experimental import pallas as pl
from jax.experimental.pallas import tpu as pltpu

IGNORE_INDEX = 255  # ignore_index passed to SingleTaskLoss.__init__
LANES = 128


def _ce_kernel(logits_ref, target_ref, loss_ref, count_ref, *,
               num_classes, ignore_index, acc_rows):
    """One (n, h) grid step.

    logits_ref: (1, C, tr, 128)   native-layout logits block (any float dtype)
    target_ref: (1, tr, 128)      integer targets
    loss_ref / count_ref: (1, acc_rows, 128) f32 per-n partial sums (resident
                                  across the h axis, written back once per n).
    """
    h = pl.program_id(1)

    tgt = target_ref[0].astype(jnp.int32)                  # (tr, 128)

    # --- class reduction over the small leading C dim, fully unrolled -------
    # Pass 1: running max + target-logit select (pure per-lane VALU).
    x0 = logits_ref[0, 0].astype(jnp.float32)              # (tr, 128)
    m = x0
    tgt_logit = x0                                          # class-0 default
    for c in range(1, num_classes):
        xc = logits_ref[0, c].astype(jnp.float32)
        m = jnp.maximum(m, xc)
        tgt_logit = jnp.where(tgt == c, xc, tgt_logit)

    # Pass 2: exp-sum only (EUP exp + VALU add); class slices re-loaded from
    # VMEM to keep live ranges short (no big f32 staging for large tiles).
    sumexp = jnp.exp(x0 - m)
    for c in range(1, num_classes):
        xc = logits_ref[0, c].astype(jnp.float32)
        sumexp = sumexp + jnp.exp(xc - m)

    lse = jnp.log(sumexp) + m                               # (tr, 128)
    valid = (tgt != ignore_index).astype(jnp.float32)       # (tr, 128)
    loss_c = (lse - tgt_logit) * valid                      # ignored -> 0

    # Collapse the tile's rows onto acc_rows sublanes with vreg adds (no XLU).
    tr = loss_c.shape[0]
    if tr != acc_rows:                                      # tr % acc_rows == 0
        loss_c = loss_c.reshape(tr // acc_rows, acc_rows, LANES).sum(axis=0)
        valid = valid.reshape(tr // acc_rows, acc_rows, LANES).sum(axis=0)

    @pl.when(h == 0)
    def _():
        loss_ref[0] = loss_c
        count_ref[0] = valid

    @pl.when(h != 0)
    def _():
        loss_ref[0] += loss_c
        count_ref[0] += valid


def _vmem_capacity_bytes():
    try:
        return int(pltpu.get_tpu_info().vmem_capacity_bytes)
    except Exception:
        return 64 << 20          # conservative (v7x per-TensorCore VMEM)


def _pick_row_tile(R, C, logit_item, tgt_item, cap):
    """Pick tr = rows of 128 lanes per grid step.

    Accounts for ALL resident VMEM: 2x double-buffered logits block,
    2x double-buffered target block (partial-output blocks are tiny and
    covered by the 1 MiB headroom).  Returns (tr, R_pad).
    """
    budget = max(6 << 20, min(cap // 2, 48 << 20))
    per_row = 2 * C * LANES * logit_item + 2 * LANES * tgt_item
    max_tr = max(1, (budget - (1 << 20)) // per_row)
    if R <= max_tr:
        return R, R                       # single h step per n, no row padding
    tr = max(8, (max_tr // 8) * 8)        # multiple of 8 for the (8,128) rule
    R_pad = ((R + tr - 1) // tr) * tr
    return tr, R_pad


def single_task_loss(output_nchw, target_nhw, *, ignore_index=IGNORE_INDEX):
    """CrossEntropyLoss(ignore_index)(output, target), reduction='mean'.

    output_nchw: (N, C, H, W) float logits (f32 or bf16; bf16 halves HBM bytes)
    target_nhw : (N, H, W)    integer class ids (int32 or any narrower integer
                              dtype that can represent ignore_index)
    """
    N, C, H, W = output_nchw.shape
    S = H * W

    # Keep narrow integer targets narrow (cast happens in-kernel) when
    # ignore_index is representable; otherwise fall back to int32.
    tgt = target_nhw
    if jnp.issubdtype(tgt.dtype, jnp.integer):
        info = jnp.iinfo(tgt.dtype)
        if not (info.min <= ignore_index <= info.max):
            tgt = tgt.astype(jnp.int32)
    else:
        tgt = tgt.astype(jnp.int32)

    logit_item = jnp.dtype(output_nchw.dtype).itemsize
    tgt_item = jnp.dtype(tgt.dtype).itemsize

    cap = _vmem_capacity_bytes()
    R = pl.cdiv(S, LANES)                     # rows of 128 lanes
    tr, R_pad = _pick_row_tile(R, C, logit_item, tgt_item, cap)
    S_pad = R_pad * LANES

    # Fold spatial dims into lane-dense rows of 128.  Free view when no
    # padding is needed; otherwise a one-time pad copy (padded pixels carry
    # target == ignore_index so they contribute 0 loss and 0 count).
    logits = output_nchw.reshape(N, C, S)
    tgt_flat = tgt.reshape(N, S)
    if S_pad != S:
        logits = jnp.pad(logits, ((0, 0), (0, 0), (0, S_pad - S)))
        tgt_flat = jnp.pad(tgt_flat, ((0, 0), (0, S_pad - S)),
                           constant_values=ignore_index)
    logits = logits.reshape(N, C, R_pad, LANES)
    tgt_flat = tgt_flat.reshape(N, R_pad, LANES)

    acc_rows = 8 if tr % 8 == 0 else tr       # tr==R (single step) otherwise
    grid = (N, R_pad // tr)

    resident = (2 * C * tr * LANES * logit_item       # logits double buffer
                + 2 * tr * LANES * tgt_item           # target double buffer
                + 4 * acc_rows * LANES * 4)           # 2 f32 outputs, 2x buf
    vmem_limit = int(max(16 << 20, min(cap - (2 << 20), resident + (8 << 20))))

    kernel = functools.partial(_ce_kernel, num_classes=C,
                               ignore_index=ignore_index, acc_rows=acc_rows)

    # TODO(synk): for very large C (vocab-style logits) a lane-axis-C variant
    # with a k-loop grid axis would be preferable to this unrolled chain.
    loss_parts, count_parts = pl.pallas_call(
        kernel,
        out_shape=(jax.ShapeDtypeStruct((N, acc_rows, LANES), jnp.float32),
                   jax.ShapeDtypeStruct((N, acc_rows, LANES), jnp.float32)),
        grid_spec=pltpu.PrefetchScalarGridSpec(
            num_scalar_prefetch=0,
            grid=grid,
            in_specs=[
                # native layout: lane = folded spatial, sublane = row tile,
                # small class axis C as a leading dim
                pl.BlockSpec((1, C, tr, LANES), lambda n, h: (n, 0, h, 0)),
                pl.BlockSpec((1, tr, LANES), lambda n, h: (n, h, 0)),
            ],
            out_specs=[
                pl.BlockSpec((1, acc_rows, LANES), lambda n, h: (n, 0, 0)),
                pl.BlockSpec((1, acc_rows, LANES), lambda n, h: (n, 0, 0)),
            ],
        ),
        compiler_params=pltpu.CompilerParams(
            dimension_semantics=("parallel", "arbitrary"),
            vmem_limit_bytes=vmem_limit),
    )(logits, tgt_flat)

    loss_sum = jnp.sum(loss_parts, dtype=jnp.float32)
    count = jnp.sum(count_parts, dtype=jnp.float32)
    # mean over non-ignored pixels (0/0 -> nan, matching PyTorch when all ignored)
    return (loss_sum / count).astype(jnp.float32)


def _reference_loss(output_nchw, target_nhw, ignore_index):
    N, C, H, W = output_nchw.shape
    logits = jnp.transpose(output_nchw, (0, 2, 3, 1)).reshape(-1, C)
    logits = logits.astype(jnp.float32)
    tgt = target_nhw.reshape(-1).astype(jnp.int32)
    lse = jax.scipy.special.logsumexp(logits, axis=-1)
    safe_tgt = jnp.clip(jnp.where(tgt == ignore_index, 0, tgt), 0, C - 1)
    tgt_logit = jnp.take_along_axis(logits, safe_tgt[:, None], axis=-1)[:, 0]
    valid = (tgt != ignore_index).astype(jnp.float32)
    return jnp.sum((lse - tgt_logit) * valid) / jnp.sum(valid)


if __name__ == "__main__":
    key = jax.random.PRNGKey(0)
    k1, k2, k3, k4, k5 = jax.random.split(key, 5)

    # --- test 1: segmentation-style, lane-exact fold (H*W % 128 == 0) -------
    N, C, H, W = 2, 4, 16, 16
    output = jax.random.normal(k1, (N, C, H, W), dtype=jnp.float32)
    target = jax.random.randint(k2, (N, H, W), 0, C, dtype=jnp.int32)
    ignore_mask = jax.random.bernoulli(k3, 0.1, (N, H, W))
    target = jnp.where(ignore_mask, IGNORE_INDEX, target)

    loss = single_task_loss(output, target)
    jax.block_until_ready(loss)
    ref = _reference_loss(output, target, IGNORE_INDEX)
    assert jnp.allclose(loss, ref, rtol=1e-5, atol=1e-5), (loss, ref)

    # --- test 2: awkward spatial size (needs padding) + bf16 logits ---------
    N2, C2, H2, W2 = 1, 3, 7, 9
    output2 = jax.random.normal(k4, (N2, C2, H2, W2), dtype=jnp.bfloat16)
    target2 = jax.random.randint(k5, (N2, H2, W2), 0, C2, dtype=jnp.int32)

    loss2 = single_task_loss(output2, target2)
    jax.block_until_ready(loss2)
    ref2 = _reference_loss(output2, target2, IGNORE_INDEX)
    assert jnp.allclose(loss2, ref2, rtol=1e-4, atol=1e-4), (loss2, ref2)

    print("KERNEL_OK")
</pallas_src>

<mosaic_0001>
module attributes {stable_mosaic.version = 11 : i64} {
  func.func @_ce_kernel(%arg0: i32, %arg1: i32, %arg2: memref<1x4x2x128xf32, #tpu.memory_space<vmem>>, %arg3: memref<1x2x128xi32, #tpu.memory_space<vmem>>, %arg4: memref<1x2x128xf32, #tpu.memory_space<vmem>>, %arg5: memref<1x2x128xf32, #tpu.memory_space<vmem>>) attributes {dimension_semantics = [#tpu.dimension_semantics<parallel>, #tpu.dimension_semantics<arbitrary>], iteration_bounds = array<i64: 2, 1>, scalar_prefetch = 0 : i64, scratch_operands = 0 : i64, tpu.core_type = #tpu.core_type<tc>, window_params = [{transform_indices = @transform_0, window_bounds = array<i64: 1, 4, 2, 128>}, {transform_indices = @transform_1, window_bounds = array<i64: 1, 2, 128>}, {transform_indices = @transform_2, window_bounds = array<i64: 1, 2, 128>}, {transform_indices = @transform_3, window_bounds = array<i64: 1, 2, 128>}]} {
    %c0 = arith.constant 0 : index
    %c0_0 = arith.constant 0 : index
    %c0_1 = arith.constant 0 : index
    %0 = vector.load %arg3[%c0, %c0_0, %c0_1] : memref<1x2x128xi32, #tpu.memory_space<vmem>>, vector<1x2x128xi32>
    %1 = vector.shape_cast %0 : vector<1x2x128xi32> to vector<2x128xi32>
    %c0_2 = arith.constant 0 : index
    %c0_3 = arith.constant 0 : index
    %c0_4 = arith.constant 0 : index
    %c0_5 = arith.constant 0 : index
    %2 = vector.load %arg2[%c0_2, %c0_3, %c0_4, %c0_5] : memref<1x4x2x128xf32, #tpu.memory_space<vmem>>, vector<1x1x2x128xf32>
    %3 = vector.shape_cast %2 : vector<1x1x2x128xf32> to vector<2x128xf32>
    %c0_6 = arith.constant 0 : index
    %c1 = arith.constant 1 : index
    %c0_7 = arith.constant 0 : index
    %c0_8 = arith.constant 0 : index
    %4 = vector.load %arg2[%c0_6, %c1, %c0_7, %c0_8] : memref<1x4x2x128xf32, #tpu.memory_space<vmem>>, vector<1x1x2x128xf32>
    %5 = vector.shape_cast %4 : vector<1x1x2x128xf32> to vector<2x128xf32>
    %6 = arith.maximumf %3, %5 : vector<2x128xf32>
    %c1_i32 = arith.constant 1 : i32
    %7 = vector.broadcast %c1_i32 : i32 to vector<2x128xi32>
    %8 = arith.cmpi eq, %1, %7 : vector<2x128xi32>
    %9 = arith.select %8, %5, %3 : vector<2x128xi1>, vector<2x128xf32>
    %c0_9 = arith.constant 0 : index
    %c2 = arith.constant 2 : index
    %c0_10 = arith.constant 0 : index
    %c0_11 = arith.constant 0 : index
    %10 = vector.load %arg2[%c0_9, %c2, %c0_10, %c0_11] : memref<1x4x2x128xf32, #tpu.memory_space<vmem>>, vector<1x1x2x128xf32>
    %11 = vector.shape_cast %10 : vector<1x1x2x128xf32> to vector<2x128xf32>
    %12 = arith.maximumf %6, %11 : vector<2x128xf32>
    %c2_i32 = arith.constant 2 : i32
    %13 = vector.broadcast %c2_i32 : i32 to vector<2x128xi32>
    %14 = arith.cmpi eq, %1, %13 : vector<2x128xi32>
    %15 = arith.select %14, %11, %9 : vector<2x128xi1>, vector<2x128xf32>
    %c0_12 = arith.constant 0 : index
    %c3 = arith.constant 3 : index
    %c0_13 = arith.constant 0 : index
    %c0_14 = arith.constant 0 : index
    %16 = vector.load %arg2[%c0_12, %c3, %c0_13, %c0_14] : memref<1x4x2x128xf32, #tpu.memory_space<vmem>>, vector<1x1x2x128xf32>
    %17 = vector.shape_cast %16 : vector<1x1x2x128xf32> to vector<2x128xf32>
    %18 = arith.maximumf %12, %17 : vector<2x128xf32>
    %c3_i32 = arith.constant 3 : i32
    %19 = vector.broadcast %c3_i32 : i32 to vector<2x128xi32>
    %20 = arith.cmpi eq, %1, %19 : vector<2x128xi32>
    %21 = arith.select %20, %17, %15 : vector<2x128xi1>, vector<2x128xf32>
    %22 = arith.subf %3, %18 : vector<2x128xf32>
    %23 = math.exp %22 : vector<2x128xf32>
    %c0_15 = arith.constant 0 : index
    %c1_16 = arith.constant 1 : index
    %c0_17 = arith.constant 0 : index
    %c0_18 = arith.constant 0 : index
    %24 = vector.load %arg2[%c0_15, %c1_16, %c0_17, %c0_18] : memref<1x4x2x128xf32, #tpu.memory_space<vmem>>, vector<1x1x2x128xf32>
    %25 = vector.shape_cast %24 : vector<1x1x2x128xf32> to vector<2x128xf32>
    %26 = arith.subf %25, %18 : vector<2x128xf32>
    %27 = math.exp %26 : vector<2x128xf32>
    %28 = arith.addf %23, %27 : vector<2x128xf32>
    %c0_19 = arith.constant 0 : index
    %c2_20 = arith.constant 2 : index
    %c0_21 = arith.constant 0 : index
    %c0_22 = arith.constant 0 : index
    %29 = vector.load %arg2[%c0_19, %c2_20, %c0_21, %c0_22] : memref<1x4x2x128xf32, #tpu.memory_space<vmem>>, vector<1x1x2x128xf32>
    %30 = vector.shape_cast %29 : vector<1x1x2x128xf32> to vector<2x128xf32>
    %31 = arith.subf %30, %18 : vector<2x128xf32>
    %32 = math.exp %31 : vector<2x128xf32>
    %33 = arith.addf %28, %32 : vector<2x128xf32>
    %c0_23 = arith.constant 0 : index
    %c3_24 = arith.constant 3 : index
    %c0_25 = arith.constant 0 : index
    %c0_26 = arith.constant 0 : index
    %34 = vector.load %arg2[%c0_23, %c3_24, %c0_25, %c0_26] : memref<1x4x2x128xf32, #tpu.memory_space<vmem>>, vector<1x1x2x128xf32>
    %35 = vector.shape_cast %34 : vector<1x1x2x128xf32> to vector<2x128xf32>
    %36 = arith.subf %35, %18 : vector<2x128xf32>
    %37 = math.exp %36 : vector<2x128xf32>
    %38 = arith.addf %33, %37 : vector<2x128xf32>
    %39 = math.log %38 : vector<2x128xf32>
    %40 = arith.addf %39, %18 : vector<2x128xf32>
    %c255_i32 = arith.constant 255 : i32
    %41 = vector.broadcast %c255_i32 : i32 to vector<2x128xi32>
    %42 = arith.cmpi ne, %1, %41 : vector<2x128xi32>
    %43 = arith.extui %42 : vector<2x128xi1> to vector<2x128xi32>
    %44 = arith.sitofp %43 : vector<2x128xi32> to vector<2x128xf32>
    %45 = arith.subf %40, %21 : vector<2x128xf32>
    %46 = arith.mulf %45, %44 : vector<2x128xf32>
    %c0_i32 = arith.constant 0 : i32
    %47 = arith.cmpi eq, %arg1, %c0_i32 : i32
    %48 = arith.extui %47 : i1 to i32
    %c0_i32_27 = arith.constant 0 : i32
    %49 = arith.cmpi ne, %48, %c0_i32_27 : i32
    scf.if %49 {
      %c0_30 = arith.constant 0 : index
      %c0_31 = arith.constant 0 : index
      %c0_32 = arith.constant 0 : index
      %53 = vector.load %arg4[%c0_30, %c0_31, %c0_32] : memref<1x2x128xf32, #tpu.memory_space<vmem>>, vector<1x2x128xf32>
      %54 = vector.shape_cast %53 : vector<1x2x128xf32> to vector<2x128xf32>
      %55 = vector.shape_cast %46 : vector<2x128xf32> to vector<1x2x128xf32>
      tpu.vector_store %arg4[%c0_30, %c0_31, %c0_32], %55 {strides = array<i32>} : memref<1x2x128xf32, #tpu.memory_space<vmem>>, vector<1x2x128xf32>,
      %c0_33 = arith.constant 0 : index
      %c0_34 = arith.constant 0 : index
      %c0_35 = arith.constant 0 : index
      %56 = vector.load %arg5[%c0_33, %c0_34, %c0_35] : memref<1x2x128xf32, #tpu.memory_space<vmem>>, vector<1x2x128xf32>
      %57 = vector.shape_cast %56 : vector<1x2x128xf32> to vector<2x128xf32>
      %58 = vector.shape_cast %44 : vector<2x128xf32> to vector<1x2x128xf32>
      tpu.vector_store %arg5[%c0_33, %c0_34, %c0_35], %58 {strides = array<i32>} : memref<1x2x128xf32, #tpu.memory_space<vmem>>, vector<1x2x128xf32>,
    } else {
    }
    %c0_i32_28 = arith.constant 0 : i32
    %50 = arith.cmpi ne, %arg1, %c0_i32_28 : i32
    %51 = arith.extui %50 : i1 to i32
    %c0_i32_29 = arith.constant 0 : i32
    %52 = arith.cmpi ne, %51, %c0_i32_29 : i32
    scf.if %52 {
      %c0_30 = arith.constant 0 : index
      %c0_31 = arith.constant 0 : index
      %c0_32 = arith.constant 0 : index
      %53 = vector.load %arg4[%c0_30, %c0_31, %c0_32] : memref<1x2x128xf32, #tpu.memory_space<vmem>>, vector<1x2x128xf32>
      %54 = vector.shape_cast %53 : vector<1x2x128xf32> to vector<2x128xf32>
      %55 = arith.addf %54, %46 : vector<2x128xf32>
      %c0_33 = arith.constant 0 : index
      %c0_34 = arith.constant 0 : index
      %c0_35 = arith.constant 0 : index
      %56 = vector.load %arg4[%c0_33, %c0_34, %c0_35] : memref<1x2x128xf32, #tpu.memory_space<vmem>>, vector<1x2x128xf32>
      %57 = vector.shape_cast %56 : vector<1x2x128xf32> to vector<2x128xf32>
      %58 = vector.shape_cast %55 : vector<2x128xf32> to vector<1x2x128xf32>
      tpu.vector_store %arg4[%c0_33, %c0_34, %c0_35], %58 {strides = array<i32>} : memref<1x2x128xf32, #tpu.memory_space<vmem>>, vector<1x2x128xf32>,
      %c0_36 = arith.constant 0 : index
      %c0_37 = arith.constant 0 : index
      %c0_38 = arith.constant 0 : index
      %59 = vector.load %arg5[%c0_36, %c0_37, %c0_38] : memref<1x2x128xf32, #tpu.memory_space<vmem>>, vector<1x2x128xf32>
      %60 = vector.shape_cast %59 : vector<1x2x128xf32> to vector<2x128xf32>
      %61 = arith.addf %60, %44 : vector<2x128xf32>
      %c0_39 = arith.constant 0 : index
      %c0_40 = arith.constant 0 : index
      %c0_41 = arith.constant 0 : index
      %62 = vector.load %arg5[%c0_39, %c0_40, %c0_41] : memref<1x2x128xf32, #tpu.memory_space<vmem>>, vector<1x2x128xf32>
      %63 = vector.shape_cast %62 : vector<1x2x128xf32> to vector<2x128xf32>
      %64 = vector.shape_cast %61 : vector<2x128xf32> to vector<1x2x128xf32>
      tpu.vector_store %arg5[%c0_39, %c0_40, %c0_41], %64 {strides = array<i32>} : memref<1x2x128xf32, #tpu.memory_space<vmem>>, vector<1x2x128xf32>,
    } else {
    }
    return
  }
  func.func @transform_0(%arg0: i32, %arg1: i32) -> (i32, i32, i32, i32) {
    %c0_i32 = arith.constant 0 : i32
    %c0_i32_0 = arith.constant 0 : i32
    %c0_i32_1 = arith.constant 0 : i32
    return %arg0, %c0_i32, %arg1, %c0_i32_0 : i32, i32, i32, i32
  }
  func.func @transform_1(%arg0: i32, %arg1: i32) -> (i32, i32, i32) {
    %c0_i32 = arith.constant 0 : i32
    %c0_i32_0 = arith.constant 0 : i32
    return %arg0, %arg1, %c0_i32 : i32, i32, i32
  }
  func.func @transform_2(%arg0: i32, %arg1: i32) -> (i32, i32, i32) {
    %c0_i32 = arith.constant 0 : i32
    %c0_i32_0 = arith.constant 0 : i32
    %c0_i32_1 = arith.constant 0 : i32
    return %arg0, %c0_i32, %c0_i32_0 : i32, i32, i32
  }
  func.func @transform_3(%arg0: i32, %arg1: i32) -> (i32, i32, i32) {
    %c0_i32 = arith.constant 0 : i32
    %c0_i32_0 = arith.constant 0 : i32
    %c0_i32_1 = arith.constant 0 : i32
    return %arg0, %c0_i32, %c0_i32_0 : i32, i32, i32
  }
}

</mosaic_0001>

<bundles_post_ra>
// kernel: tpu_custom_call.1
= control target key start
LH: loop header
LB: loop body
LE: loop exit
PB: predicated region body
PF: predicated region fallthrough
CT: control target
= control target key end

     0   :  { %9 = vsyncpa [#allocation3], 0  ;;  %s1069_s0 = inlined_call_operand.hbm [shape: f32[2,4,2,128], index: 0, kind: input, shape index: {}]   ;;  %s1070_s1 = inlined_call_operand.hbm [shape: s32[2,2,128], index: 1, kind: input, shape index: {}]   ;;  %s1071_s2 = inlined_call_operand.hbm [shape: f32[2,2,128], index: 2, kind: output, shape index: {0}]   ;;  %s1072_s3 = inlined_call_operand.hbm [shape: f32[2,2,128], index: 3, kind: output, shape index: {1}]  }
   0x1   :  { %11 = vsyncpa [#allocation3 + $0x1], 0 }
   0x2   :  { %12 = vsyncpa [#allocation6], 0 }
   0x3   :  { %14 = vsyncpa [#allocation6 + $0x1], 0 }
   0x4   :  { %15 = vsyncpa [#allocation4], 0 }
   0x5   :  { %17 = vsyncpa [#allocation4 + $0x1], 0 }
   0x6   :  { %18 = vsyncpa [#allocation9], 0 }
   0x7   :  { %20 = vsyncpa [#allocation9 + $0x1], 0  ;;  %s796_s12 = smov 0   ;;  %s798_s13 = smov 0  }
   0x8   :  { %s800_s14 = smov 0   ;;  %s802_s15 = smov 0  }
   0x9   :  { %s804_s16 = smov 0   ;;  %s806_s17 = smov 0  }
   0xa LB: > { %s479_s18 = sadd.s32 4294967295, %s767_s17   ;;  %s480_s19 = sadd.s32 4294967294, %s767_s17   ;;  %s767_s17 = sphi %s806_s17, %s26_s17   ;;  %s763_s16 = sphi %s804_s16, %s1091_s16   ;;  %s759_s15 = sphi %s802_s15, %s1090_s15   ;;  %s755_s14 = sphi %s800_s14, %s1089_s14   ;;  %s751_s13 = sphi %s798_s13, %s1088_s13   ;;  %s747_s12 = sphi %s796_s12, %s1087_s12  }
   0xb   : > { %s38_s20 = sadd.s32 1, %s763_s16  ;;  %s47_s21 = sadd.s32 1, %s755_s14 }
   0xc   : > { %p40_p0 = scmp.ge.s32.totalorder %s38_s20, 2  ;;  %p54_p1 = scmp.ne.s32.totalorder %s755_s14, %s751_s13 }
   0xd   : > { %p55_p2 = scmp.eq.s32.totalorder %s767_s17, 0  ;;  %p60_p3 = scmp.ne.s32.totalorder %s751_s13, %s747_s12 }
   0xe   : > { %s1093_s20 = smov (%p40_p0, %s38_s20), 0  ;;  %p61_p5 = scmp.eq.s32.totalorder %s479_s18, 0 }
   0xf   : > { %p837_p4 = por %p55_p2, %p54_p1  ;;  %s42_s23 = ssub.s32 %s763_s16, %s1093_s20 }
  0x10   : > { %p112_p6 = scmp.eq.s32.totalorder %s479_s18, 1  ;;  %p45_p7 = scmp.eq.s32.totalorder %s42_s23, 0 }
  0x11   : > { %p843_p8 = por %p61_p5, %p60_p3  ;;  %p118_p10 = scmp.eq.s32.totalorder %s480_s19, 1 }
  0x12   : > { %p847_p9 = por %p112_p6, %p54_p1  ;;  %p526_p13 = scmp.lt.s32.totalorder %s767_s17, 2 }
  0x13   : > { %s1076_s24 = scalar_select %p843_p8, 1, 0 }
  0x14   : > { %s1077_s25 = scalar_select %p847_p9, 1, 0 }
  0x15   : > { %s852_s26 = scalar_select %p45_p7, %s755_s14, %s47_s21  }
  0x16   : > { %p854_p11 = por %p118_p10, %p60_p3  ;;  %s861_s28 = sand.u32 1, %s755_s14  }
  0x17   : > { %s483_s29 = sshll.u32 %s861_s28, 3  ;;  %s503_s30 = sshll.u32 %s763_s16, 7 }
  0x18   : > { %s1078_s27 = scalar_select %p854_p11, 1, 0 }
  0x19   : > { %s868_s6 = scalar_lea.hbm %s1069_s0, %s503_s30  ;;  %s168_s7 = scalar_lea.vmem [#allocation2], %s483_s29 }
  0x1a   : > { %s176_s8 = sshll.u32 %s168_s7, 4  ;;  %p874_p0 = pnand %p526_p13, %p837_p4  ;;  %s870_s8 = int_to_ptr.vmem [resolvable:$true] %s176_s8 }
  0x1b   : > { %s165_s10 = scalar_lea.sflag [#allocation3], %s861_s28  ;;  %s589_s11 = scalar_lea.hbm %s868_s6, 128 }
  0x1c   : > { %p590_p2 = scmp.ne.s32.totalorder %s868_s6, %s589_s11  ;;  %p591_p3 = pneg %p874_p0 }
  0x1d   : > { %s594_s21 = scalar_lea.hbm %s1069_s0, 256  ;;  %p595_p4 = scmp.lt.u32.totalorder %s868_s6, %s1069_s0 }
  0x1e   : > { %p592_p5 = pnand %p591_p3, %p590_p2  ;;  %p596_p7 = scmp.lt.u32.totalorder %s594_s21, %s589_s11 }
  0x1f   : > { %p598_p13 = scmp.lt.u32.totalorder %s589_s11, %s868_s6 }
  0x20   : > { %p593_p6 = pneg %p592_p5  ;;  %p597_p10 = por %p596_p7, %p595_p4 }
  0x22   : > { %p599_p12 = por %p598_p13, %p597_p10 }
  0x24   : > { %p600_p1 = pnand %p599_p12, %p593_p6 }
  0x26   : > { %603 = shalt.err (!%p600_p1)
}
  0x27   : > { %s604_s29 = scalar_lea.vmem %s870_s8, 128  ;;  %s769_s30 = smov [#allocation2]  }
  0x28   : > { %p605_p2 = scmp.ne.s32.totalorder %s870_s8, %s604_s29  ;;  %s609_s4 = sshll.u32 %s769_s30, 4  ;;  %s610_s4 = int_to_ptr.vmem [resolvable:$false] %s609_s4 }
  0x29   : > { %s611_s5 = scalar_lea.vmem %s610_s4, 256  ;;  %p612_p9 = scmp.lt.s32.totalorder %s870_s8, %s610_s4 }
  0x2a   : > { %p607_p5 = pnand %p605_p2, %p591_p3  ;;  %p613_p4 = scmp.lt.s32.totalorder %s611_s5, %s604_s29 }
  0x2c   : > { %p608_p11 = pneg %p607_p5  ;;  %p614_p7 = por %p613_p4, %p612_p9 }
  0x2e   : > { %p615_p10 = pnand %p614_p7, %p608_p11 }
  0x30   : > { %618 = shalt.err (!%p615_p10)
}
  0x31   : > { %s770_s7 = smov 32   ;;  %s771_s11 = smov 2  }
  0x32   : > { %515 = dma.hbm_to_vmem [thread:$0]  (!%p874_p0), %s868_s6, 128, %s870_s8, %s165_s10, %s770_s7, %s770_s7, %s771_s11  }
  0x33   : > { %p203_p12 = scmp.lt.s32.totalorder %s767_s17, 3  ;;  %s486_s18 = sshll.u32 %s861_s28, 1 }
  0x34   : > { %s487_s19 = sshll.u32 %s763_s16, 5  ;;  %p1080_p9 = scmp.ge.s32.totalorder %s767_s17, 1 }
  0x35   : > { %s919_s29 = scalar_lea.hbm %s1070_s1, %s487_s19  ;;  %s190_s30 = scalar_lea.vmem [#allocation5], %s486_s18 }
  0x36   : > { %p912_p11 = pnand %p1080_p9, %p203_p12  ;;  %s198_s4 = sshll.u32 %s190_s30, 4  ;;  %s199_s4 = int_to_ptr.vmem [resolvable:$true] %s198_s4 }
  0x37   : > { %s187_s6 = scalar_lea.sflag [#allocation6], %s861_s28  ;;  %s619_s8 = scalar_lea.hbm %s919_s29, 32 }
  0x38   : > { %s1081_s21 = scalar_select %p912_p11, 1, 0 }
  0x39   : > { %p620_p1 = scmp.ne.s32.totalorder %s919_s29, %s619_s8  ;;  %s624_s7 = scalar_lea.hbm %s1070_s1, 64 }
  0x3a   : > { %p625_p2 = scmp.lt.u32.totalorder %s919_s29, %s1070_s1  ;;  %p626_p5 = scmp.lt.u32.totalorder %s624_s7, %s619_s8 }
  0x3b   : > { %p622_p6 = pnand %p620_p1, %p591_p3  ;;  %p628_p7 = scmp.lt.u32.totalorder %s619_s8, %s919_s29 }
  0x3c   : > { %p627_p4 = por %p626_p5, %p625_p2 }
  0x3d   : > { %p623_p13 = pneg %p622_p6 }
  0x3e   : > { %p629_p10 = por %p628_p7, %p627_p4 }
  0x40   : > { %p630_p12 = pnand %p629_p10, %p623_p13 }
  0x42   : > { %633 = shalt.err (!%p630_p12)
}
  0x43   : > { %s634_s28 = scalar_lea.vmem %s199_s4, 32  ;;  %s772_s18 = smov [#allocation5]  }
  0x44   : > { %p635_p9 = scmp.ne.s32.totalorder %s199_s4, %s634_s28  ;;  %s639_s22 = sshll.u32 %s772_s18, 4  ;;  %s640_s22 = int_to_ptr.vmem [resolvable:$false] %s639_s22 }
  0x45   : > { %s641_s23 = scalar_lea.vmem %s640_s22, 64  ;;  %p642_p8 = scmp.lt.s32.totalorder %s199_s4, %s640_s22 }
  0x46   : > { %p637_p1 = pnand %p635_p9, %p591_p3  ;;  %p643_p11 = scmp.lt.s32.totalorder %s641_s23, %s634_s28 }
  0x48   : > { %p638_p6 = pneg %p637_p1  ;;  %p644_p2 = por %p643_p11, %p642_p8 }
  0x4a   : > { %p645_p5 = pnand %p644_p2, %p638_p6 }
  0x4c   : > { %648 = shalt.err (!%p645_p5)
}
  0x4d   : > { %518 = dma.hbm_to_vmem [thread:$0]  (!%p874_p0), %s919_s29, 32, %s199_s4, %s187_s6  }
  0x4e   : > { %p1082_p13 = scmp.ne.s32.totalorder %s1081_s21, 0 }
  0x4f   : > { %s944_s30 = sand.u32 (!%p1082_p13), 1, %s751_s13   ;;  %p1083_p3 = scmp.ne.s32.totalorder (!%p1082_p13), %s1076_s24, 0 }
  0x50   : > { %207 = sbr.rel (%p1082_p13) target bundleno = 171 (0xab), region = 28  ;;  %s489_s8 = sshll.u32 (!%p1082_p13), %s944_s30, 3 }
  0x51   : > { %s210_s10 = scalar_lea.sflag (!%p1082_p13), [#allocation3], %s944_s30  ;;  %s213_s5 = scalar_lea.vmem (!%p1082_p13), [#allocation2], %s489_s8 }
  0x57   : > { %730 = dma.done.wait (%p1083_p3), %s210_s10, 128  }
  0x58   : > { %732 = vsyncadd (%p1083_p3), %s210_s10, 4294967168  ;;  %s953_s9 = sshll.u32 %s944_s30, 1  ;;  %s219_s21 = scalar_lea.sflag [#allocation6], %s944_s30 }
  0x59   : > { %s222_s29 = scalar_lea.vmem [#allocation5], %s953_s9 }
  0x5a   : > { %734 = dma.done.wait (%p1083_p3), %s219_s21, 32  }
  0x5b   : > { %736 = vsyncadd (%p1083_p3), %s219_s21, 4294967264  ;;  %s254_s4 = scalar_lea.vmem [#allocation8], %s953_s9  ;;  %s499_s7 = sshll.u32 %s759_s15, 5  ;;  %v963_v0 = vld [vmem:[%s213_s5] sm:$0x3]  ;;  %v773_v7 = vmov 0.0  }
  0x5c   : > { %s343_s6 = sshll.u32 %s254_s4, 4  ;;  %v493_v1 = vld [vmem:[%s213_s5 + $0x2] sm:$0x3]  ;;  %v965_v2 = vld [vmem:[%s222_s29] sm:$0x3]  ;;  %s978_s19 = scalar_lea.hbm %s1072_s3, %s499_s7  ;;  %s968_s6 = int_to_ptr.vmem [resolvable:$true] %s343_s6 }
  0x5d   : > { %v259_v3 = vmax.f32 %v963_v0, %v493_v1  ;;  %v494_v4 = vld [vmem:[%s213_s5 + $0x4] sm:$0x3]  ;;  %v970_v5 = vld [vmem:[%s213_s5 + $0x6] sm:$0x3]  ;;  %vm290_vm0 = vcmp.ne.s32.totalorder %v965_v2, 255  ;;  %s317_s28 = scalar_lea.sflag [#allocation9], %s944_s30 }
  0x5e   : > { %v980_v8 = vsel %vm290_vm0, 1.0, %v773_v7  ;;  %s649_s18 = scalar_lea.vmem %s968_s6, 32  ;;  %p1084_p0 = scmp.ne.s32.totalorder %s1077_s25, 0 }
  0x5f   : > { %v264_v6 = vmax.f32 %v259_v3, %v494_v4  ;;  %300 = vst [vmem:[%s254_s4] sm:$0x3] %v980_v8  ;;  %p650_p8 = scmp.ne.s32.totalorder %s968_s6, %s649_s18  ;;  %s774_s22 = smov [#allocation8]  }
  0x60   : > { %s653_s23 = sshll.u32 %s774_s22, 4  ;;  %s654_s23 = int_to_ptr.vmem [resolvable:$false] %s653_s23 }
  0x61   : > { %v269_v9 = vmax.f32 %v264_v6, %v970_v5  ;;  %p651_p11 = pnand %p650_p8, %p1084_p0  ;;  %s655_s8 = scalar_lea.vmem %s654_s23, 64 }
  0x62   : > { %p656_p7 = scmp.lt.s32.totalorder %s968_s6, %s654_s23  ;;  %p657_p10 = scmp.lt.s32.totalorder %s655_s8, %s649_s18 }
  0x63   : > { %p652_p4 = pneg %p651_p11 }
  0x64   : > { %p658_p12 = por %p657_p10, %p656_p7 }
  0x66   : > { %p659_p9 = pnand %p658_p12, %p652_p4 }
  0x68   : > { %662 = shalt.err (!%p659_p9)
}
  0x69   : > { %s663_s10 = scalar_lea.hbm %s978_s19, 32  ;;  %s667_s29 = scalar_lea.hbm %s1072_s3, 64 }
  0x6a   : > { %p664_p1 = scmp.ne.s32.totalorder %s978_s19, %s663_s10  ;;  %p668_p5 = scmp.lt.u32.totalorder %s978_s19, %s1072_s3 }
  0x6b   : > { %p669_p13 = scmp.lt.u32.totalorder %s667_s29, %s663_s10  ;;  %p671_p8 = scmp.lt.u32.totalorder %s663_s10, %s978_s19 }
  0x6c   : > { %p665_p6 = pnand %p664_p1, %p1084_p0 }
  0x6d   : > { %p670_p3 = por %p669_p13, %p668_p5 }
  0x6e   : > { %p666_p2 = pneg %p665_p6 }
  0x6f   : > { %p672_p11 = por %p671_p8, %p670_p3 }
  0x71   : > { %p673_p4 = pnand %p672_p11, %p666_p2 }
  0x73   : > { %676 = shalt.err (!%p673_p4)
}
  0x74   : > { %509 = dma.vmem_to_hbm [thread:$0]  (%p1084_p0), %s968_s6, 32, %s978_s19, %s317_s28   ;;  %v272_v10 = vsub.f32 %v963_v0, %v269_v9  ;;  %v275_v11 = vsub.f32 %v493_v1, %v269_v9  ;;  %v279_v12 = vsub.f32 %v494_v4, %v269_v9  ;;  %v283_v13 = vsub.f32 %v970_v5, %v269_v9 }
  0x75   : > { %vm260_vm1 = vcmp.eq.s32.totalorder %v965_v2, 1  ;;  %vm265_vm2 = vcmp.eq.s32.totalorder %v965_v2, 2  ;;  %vm270_vm3 = vcmp.eq.s32.totalorder %v965_v2, 3  ;;  %s247_s6 = scalar_lea.vmem [#allocation7], %s953_s9  ;;  %s1022_s18 = scalar_lea.hbm %s1071_s2, %s499_s7 }
  0x76   : > { %v273_v14 = vmul.f32 1.442695, %v272_v10  ;;  %v276_v15 = vmul.f32 1.442695, %v275_v11  ;;  %v280_v16 = vmul.f32 1.442695, %v279_v12  ;;  %v261_v25 = vsel %vm260_vm1, %v493_v1, %v963_v0 }
  0x77   : > { %v284_v17 = vmul.f32 1.442695, %v283_v13  ;;  %v266_v26 = vsel %vm265_vm2, %v494_v4, %v261_v25  ;;  %s330_s11 = sshll.u32 %s247_s6, 4  ;;  %s312_s22 = scalar_lea.sflag [#allocation4], %s944_s30  ;;  %s1014_s11 = int_to_ptr.vmem [resolvable:$true] %s330_s11 }
  0x78   : > { %579 = vpow2.f32 %v273_v14  ;;  %v271_v29 = vsel %vm270_vm3, %v970_v5, %v266_v26  ;;  %s677_s23 = scalar_lea.vmem %s1014_s11, 32  ;;  %s775_s9 = smov [#allocation7]  }
  0x79   : > { %581 = vpow2.f32 %v276_v15  ;;  %p678_p7 = scmp.ne.s32.totalorder %s1014_s11, %s677_s23  ;;  %s681_s8 = sshll.u32 %s775_s9, 4  ;;  %s682_s8 = int_to_ptr.vmem [resolvable:$false] %s681_s8 }
  0x7a   : > { %583 = vpow2.f32 %v280_v16  ;;  %s683_s10 = scalar_lea.vmem %s682_s8, 64  ;;  %p684_p9 = scmp.lt.s32.totalorder %s1014_s11, %s682_s8 }
  0x7b   : > { %585 = vpow2.f32 %v284_v17  ;;  %p679_p10 = pnand %p678_p7, %p1084_p0  ;;  %p685_p1 = scmp.lt.s32.totalorder %s683_s10, %s677_s23 }
  0x7d   : > { %p680_p12 = pneg %p679_p10  ;;  %p686_p6 = por %p685_p1, %p684_p9 }
  0x7f   : > { %p687_p2 = pnand %p686_p6, %p680_p12 }
  0x82   : > { %v580_v18 = vpop.eup %579 }
  0x83   : > { %v582_v19 = vpop.eup %581 }
  0x84   : > { %v584_v20 = vpop.eup %583  ;;  %v278_v21 = vadd.f32 %v582_v19, %v580_v18 }
  0x85   : > { %v586_v22 = vpop.eup %585 }
  0x86   : > { %v282_v23 = vadd.f32 %v584_v20, %v278_v21 }
  0x88   : > { %v286_v24 = vadd.f32 %v586_v22, %v282_v23 }
  0x8a   : > { %587 = vlog2.f32 %v286_v24 }
  0x94   : > { %v588_v27 = vpop.eup %587 }
  0x95   : > { %v288_v28 = vmul.f32 0.6931472, %v588_v27 }
  0x97   : > { %v289_v30 = vadd.f32 %v288_v28, %v269_v9 }
  0x99   : > { %v293_v31 = vsub.f32 %v289_v30, %v271_v29 }
  0x9b   : > { %v294_v32 = vmul.f32 %v980_v8, %v293_v31 }
  0x9d   : > { %299 = vst [vmem:[%s247_s6] sm:$0x3] %v294_v32 }
  0x9e   : > { %690 = shalt.err (!%p687_p2)
}
  0x9f   : > { %s691_s15 = scalar_lea.hbm %s1022_s18, 32  ;;  %s695_s5 = scalar_lea.hbm %s1071_s2, 64 }
  0xa0   : > { %p692_p5 = scmp.ne.s32.totalorder %s1022_s18, %s691_s15  ;;  %p696_p8 = scmp.lt.u32.totalorder %s1022_s18, %s1071_s2 }
  0xa1   : > { %p697_p11 = scmp.lt.u32.totalorder %s695_s5, %s691_s15  ;;  %p699_p7 = scmp.lt.u32.totalorder %s691_s15, %s1022_s18 }
  0xa2   : > { %p693_p13 = pnand %p692_p5, %p1084_p0 }
  0xa3   : > { %p698_p4 = por %p697_p11, %p696_p8 }
  0xa4   : > { %p694_p3 = pneg %p693_p13 }
  0xa5   : > { %p700_p10 = por %p699_p7, %p698_p4 }
  0xa7   : > { %p701_p12 = pnand %p700_p10, %p694_p3 }
  0xa9   : > { %704 = shalt.err (!%p701_p12)
}
  0xaa   : > { %508 = dma.vmem_to_hbm [thread:$0]  (%p1084_p0), %s1014_s11, 32, %s1022_s18, %s312_s22  }
  0xab PF: > { %s355_s4 = sand.u32 1, %s747_s12   ;;  %p1085_p9 = scmp.ne.s32.totalorder %s1078_s27, 0 }
  0xac   : > { %p1086_p1 = scmp.ge.s32.totalorder %s767_s17, 2  ;;  %s356_s24 = scalar_lea.sflag [#allocation4], %s355_s4 }
  0xae   : > { %p520_p6 = pnand %p1086_p1, %p1085_p9 }
  0xb0   : > { %738 = dma.done.wait (!%p520_p6), %s356_s24, 32  }
  0xb1   : > { %740 = vsyncadd (!%p520_p6), %s356_s24, 4294967264  ;;  %s365_s6 = scalar_lea.sflag [#allocation9], %s355_s4 }
  0xb2   : > { %742 = dma.done.wait (!%p520_p6), %s365_s6, 32  }
  0xb3   : > { %744 = vsyncadd (!%p520_p6), %s365_s6, 4294967264  ;;  %s26_s17 = sadd.s32 1, %s767_s17   ;;  %s1087_s12 = smov %s751_s13 }
  0xb4   : > { %p23_p2 = scmp.ge.s32.totalorder %s26_s17, 4   ;;  %s1088_s13 = smov %s755_s14 }
  0xb5   : > { %s1089_s14 = smov %s852_s26  ;;  %s1090_s15 = smov %s763_s16 }
  0xb6   : > { %s1091_s16 = smov %s1093_s20  ;;  %25 = sbr.rel (!%p23_p2) target bundleno = 10 (0xa), region = 114 }
  0xbd   :  { %370 = vsyncpa [#allocation3], 1 }
  0xbe   :  { %372 = vsyncpa [#allocation3 + $0x1], 1 }
  0xbf   :  { %373 = vsyncpa [#allocation6], 1 }
  0xc0   :  { %375 = vsyncpa [#allocation6 + $0x1], 1 }
  0xc1   :  { %376 = vsyncpa [#allocation4], 1 }
  0xc2   :  { %378 = vsyncpa [#allocation4 + $0x1], 1 }
  0xc3   :  { %379 = vsyncpa [#allocation9], 1 }
  0xc4   :  { %381 = vsyncpa [#allocation9 + $0x1], 1 }

</bundles_post_ra>
